<compile_context>
chip_gen: v7x
topology: tpu7x:2x2x1
jax: 0.10.0
libtpu: 0.0.40
codegen_flags: <defaults>
</compile_context>

<pallas_src>
import math

import jax
import jax.numpy as jnp
from jax.experimental import pallas as pl
from jax.experimental.pallas import tpu as pltpu


def _build_pe_table(d_model: int, max_seq_length: int) -> jnp.ndarray:
    """Replicates the torch buffer `pe` (shape [max_seq_length, d_model])."""
    position = jnp.arange(max_seq_length, dtype=jnp.float32)[:, None]
    div_term = jnp.exp(
        jnp.arange(0, d_model, 2, dtype=jnp.float32) * (-math.log(10000.0) / d_model)
    )
    angles = position * div_term                      # [max_seq_length, d_model//2]
    pe = jnp.zeros((max_seq_length, d_model), dtype=jnp.float32)
    pe = pe.at[:, 0::2].set(jnp.sin(angles))
    pe = pe.at[:, 1::2].set(jnp.cos(angles))
    return pe


# --------------------------- kernels ---------------------------------------

def _add_pe_kernel(x_ref, pe_ref, o_ref):
    # x_ref: (TB, TC); pe_ref: (1, TC) -> plain jnp row-broadcast, no reshape.
    o_ref[...] = (x_ref[...] + pe_ref[...]).astype(o_ref.dtype)


def _add_pe_dropout_kernel(x_ref, pe_ref, m_ref, o_ref):
    # m_ref already carries the inverted-dropout scale: values in {0, 1/(1-p)}.
    o_ref[...] = ((x_ref[...] + pe_ref[...]) * m_ref[...]).astype(o_ref.dtype)


# --------------------------- tiling helpers ---------------------------------

def _choose_row_tile(n_rows: int) -> int:
    # 2nd-to-last block dim must be a multiple of 8 or equal the full dim.
    return 8 if n_rows % 8 == 0 else n_rows


def _choose_col_tile(n_cols: int, rows_per_tile: int, bytes_per_elem: int,
                     target_bytes: int = 2 << 20) -> int:
    """Largest multiple of 128 dividing n_cols with tile size ~<= target."""
    if n_cols % 128 != 0:
        return n_cols  # full axis is always a legal block extent
    max_cols = target_bytes // max(1, rows_per_tile * bytes_per_elem)
    max_cols = max(128, (max_cols // 128) * 128)
    best = 128
    c = 128
    while c <= min(n_cols, max_cols):
        if n_cols % c == 0:
            best = c
        c += 128
    return best


# --------------------------- wrapper ----------------------------------------

def positional_encoding_forward(x: jnp.ndarray,
                                pe_table: jnp.ndarray,
                                *,
                                dropout_p: float = 0.1,
                                training: bool = False,
                                rng_key=None) -> jnp.ndarray:
    """x: [B, S, D]. Returns dropout(x + pe[:S, :]) with the module's semantics."""
    B, S, D = x.shape
    assert pe_table.shape[0] >= S and pe_table.shape[1] == D

    if training and dropout_p >= 1.0:
        return jnp.zeros_like(x)            # torch Dropout(p=1) zeroes everything
    use_dropout = training and dropout_p > 0.0

    N = S * D
    x2 = x.reshape(B, N)                                   # lane-dense last axis
    pe2 = pe_table[:S, :].astype(jnp.float32).reshape(1, N)

    bytes_per = jnp.dtype(x.dtype).itemsize
    TB = _choose_row_tile(B)
    TC = _choose_col_tile(N, TB, bytes_per)
    n_row_tiles = B // TB
    n_col_tiles = N // TC

    # Column tiles OUTER so the pe block index is constant across inner steps
    # (Pallas skips the re-DMA when consecutive block indices are unchanged).
    grid = (n_col_tiles, n_row_tiles)

    x_spec = pl.BlockSpec((TB, TC), lambda c, r: (r, c))
    pe_spec = pl.BlockSpec((1, TC), lambda c, r: (0, c))
    out_spec = pl.BlockSpec((TB, TC), lambda c, r: (r, c))

    # VMEM budget: double-buffered x/out(/mask) blocks + pe block, 2x headroom.
    blk_bytes = TB * TC * bytes_per
    mask_bytes = TB * TC * 4 if use_dropout else 0
    needed = 2 * (blk_bytes + blk_bytes + mask_bytes) + 2 * TC * 4
    vmem_limit = int(min(64 << 20, max(16 << 20, 2 * needed)))

    cparams = pltpu.CompilerParams(
        dimension_semantics=("parallel", "parallel"),   # no carried state
        vmem_limit_bytes=vmem_limit,
    )

    if use_dropout:
        if rng_key is None:
            rng_key = jax.random.PRNGKey(0)
        keep_p = 1.0 - float(dropout_p)
        mask = (jax.random.bernoulli(rng_key, keep_p, (B, N)).astype(jnp.float32)
                * jnp.float32(1.0 / keep_p))
        kernel = _add_pe_dropout_kernel
        in_specs = [x_spec, pe_spec,
                    pl.BlockSpec((TB, TC), lambda c, r: (r, c))]
        operands = (x2, pe2, mask)
    else:
        kernel = _add_pe_kernel
        in_specs = [x_spec, pe_spec]
        operands = (x2, pe2)

    out2 = pl.pallas_call(
        kernel,
        out_shape=jax.ShapeDtypeStruct((B, N), x.dtype),
        grid=grid,
        in_specs=in_specs,
        out_specs=out_spec,
        compiler_params=cparams,
    )(*operands)
    return out2.reshape(B, S, D)


# --------------------------- demo / self-check -------------------------------

if __name__ == "__main__":
    # Small shapes consistent with the module: [batch, seq, d_model]
    B, S, D = 2, 8, 32
    max_seq_length = 64
    dropout_p = 0.1

    key = jax.random.PRNGKey(0)
    kx, kd = jax.random.split(key)
    x = jax.random.normal(kx, (B, S, D), dtype=jnp.float32)
    pe_table = _build_pe_table(D, max_seq_length)

    # Eval mode (dropout = identity): exact match against plain-JAX reference.
    out_eval = positional_encoding_forward(x, pe_table, dropout_p=dropout_p,
                                           training=False)
    out_eval = jax.block_until_ready(out_eval)
    ref = x + pe_table[None, :S, :]
    assert out_eval.shape == (B, S, D)
    assert jnp.allclose(out_eval, ref, atol=1e-6), "eval-mode mismatch"

    # Training mode: inverted dropout. Kept entries == ref/(1-p), dropped == 0.
    out_train = positional_encoding_forward(x, pe_table, dropout_p=dropout_p,
                                            training=True, rng_key=kd)
    out_train = jax.block_until_ready(out_train)
    assert out_train.shape == (B, S, D)
    scaled_ref = ref / (1.0 - dropout_p)
    kept = out_train != 0
    assert jnp.allclose(jnp.where(kept, out_train, scaled_ref), scaled_ref,
                        atol=1e-5), "training-mode dropout mismatch"

    print("KERNEL_OK")
</pallas_src>

<mosaic_0001>
module attributes {stable_mosaic.version = 11 : i64} {
  func.func @_add_pe_kernel(%arg0: i32, %arg1: i32, %arg2: memref<2x256xf32, #tpu.memory_space<vmem>>, %arg3: memref<1x256xf32, #tpu.memory_space<vmem>>, %arg4: memref<2x256xf32, #tpu.memory_space<vmem>>) attributes {dimension_semantics = [#tpu.dimension_semantics<parallel>, #tpu.dimension_semantics<parallel>], iteration_bounds = array<i64: 1, 1>, scalar_prefetch = 0 : i64, scratch_operands = 0 : i64, tpu.core_type = #tpu.core_type<tc>, window_params = [{transform_indices = @transform_0, window_bounds = array<i64: 2, 256>}, {transform_indices = @transform_1, window_bounds = array<i64: 1, 256>}, {transform_indices = @transform_2, window_bounds = array<i64: 2, 256>}]} {
    %c0 = arith.constant 0 : index
    %c0_0 = arith.constant 0 : index
    %0 = vector.load %arg2[%c0, %c0_0] : memref<2x256xf32, #tpu.memory_space<vmem>>, vector<2x256xf32>
    %c0_1 = arith.constant 0 : index
    %c0_2 = arith.constant 0 : index
    %1 = vector.load %arg3[%c0_1, %c0_2] : memref<1x256xf32, #tpu.memory_space<vmem>>, vector<1x256xf32>
    %2 = vector.broadcast %1 : vector<1x256xf32> to vector<2x256xf32>
    %3 = arith.addf %0, %2 : vector<2x256xf32>
    %c0_3 = arith.constant 0 : index
    %c0_4 = arith.constant 0 : index
    %4 = vector.load %arg4[%c0_3, %c0_4] : memref<2x256xf32, #tpu.memory_space<vmem>>, vector<2x256xf32>
    tpu.vector_store %arg4[%c0_3, %c0_4], %3 {strides = array<i32>} : memref<2x256xf32, #tpu.memory_space<vmem>>, vector<2x256xf32>,
    return
  }
  func.func @transform_0(%arg0: i32, %arg1: i32) -> (i32, i32) {
    %c0_i32 = arith.constant 0 : i32
    return %arg1, %arg0 : i32, i32
  }
  func.func @transform_1(%arg0: i32, %arg1: i32) -> (i32, i32) {
    %c0_i32 = arith.constant 0 : i32
    %c0_i32_0 = arith.constant 0 : i32
    return %c0_i32, %arg0 : i32, i32
  }
  func.func @transform_2(%arg0: i32, %arg1: i32) -> (i32, i32) {
    %c0_i32 = arith.constant 0 : i32
    return %arg1, %arg0 : i32, i32
  }
}

</mosaic_0001>

<bundles_post_ra>
// kernel: tpu_custom_call.1
= control target key start
LH: loop header
LB: loop body
LE: loop exit
PB: predicated region body
PF: predicated region fallthrough
CT: control target
= control target key end

     0   :  { %7 = vsyncpa [#allocation3], 0  ;;  %s157_s0 = inlined_call_operand.hbm [shape: f32[2,256], index: 0, kind: input, shape index: {}]   ;;  %s158_s1 = inlined_call_operand.vmem [shape: f32[1,256], index: 1, kind: input, shape index: {}]   ;;  %s159_s2 = inlined_call_operand.hbm [shape: f32[2,256], index: 2, kind: output, shape index: {}]  }
   0x1   :  { %8 = vsyncpa [#allocation4], 0  ;;  %s112_s9 = smov [#allocation2]   ;;  %s64_s13 = scalar_lea.hbm %s157_s0, 64 }
   0x2   :  { %s15_s10 = sshll.u32 %s112_s9, 4  ;;  %p65_p0 = scmp.ne.s32.totalorder %s157_s0, %s64_s13  ;;  %s16_s10 = int_to_ptr.vmem [resolvable:$true] %s15_s10 }
   0x3   :  { %p68_p1 = scmp.lt.u32.totalorder %s64_s13, %s157_s0 }
   0x5   :  { %p70_p2 = pnand %p68_p1, %p65_p0 }
   0x7   :  { %73 = shalt.err (!%p70_p2)
}
   0x8   :  { %s74_s18 = scalar_lea.vmem %s16_s10, 64  ;;  %p79_p4 = scmp.lt.s32.totalorder %s16_s10, %s16_s10 }
   0x9   :  { %p75_p3 = scmp.ne.s32.totalorder %s16_s10, %s74_s18  ;;  %p80_p5 = scmp.lt.s32.totalorder %s74_s18, %s74_s18 }
   0xb   :  { %p81_p6 = por %p80_p5, %p79_p4 }
   0xd   :  { %p82_p7 = pnand %p81_p6, %p75_p3 }
   0xf   :  { %85 = shalt.err (!%p82_p7)
}
  0x10   :  { %18 = dma.hbm_to_vmem [thread:$0]  %s157_s0, 64, %s16_s10, [#allocation3]  }
  0x11   :  { %108 = dma.done.wait [#allocation3], 64  }
  0x12   :  { %109 = vsyncadd [#allocation3], 4294967232  ;;  %v27_v0 = vlaneseq  ;;  %v113_v1 = vmov 1983009808   ;;  %v25_v7 = vld [vmem:[%s158_s1] sm:$0x3] }
  0x13   :  { %v37_v2 = vunpack.c.l.s4 %v113_v1  ;;  %v24_v12 = vld [vmem:[#allocation2] sm:$0xf]  ;;  %s114_s23 = smov [#allocation5]  }
  0x14   :  { %v28_v3 = vshrl.u32 %v27_v0, 7  ;;  %s52_s0 = sshll.u32 %s114_s23, 4  ;;  %s53_s0 = int_to_ptr.vmem [resolvable:$true] %s52_s0 }
  0x15   :  { %v38_v6 = vunpack.c.0.s8 %v37_v2  ;;  %s86_s24 = scalar_lea.vmem %s53_s0, 64  ;;  %p91_p9 = scmp.lt.s32.totalorder %s53_s0, %s53_s0 }
  0x16   :  { %v29_v4 = vsub.s32 0, %v28_v3  ;;  %v33_v5 = vsub.s32 1, %v28_v3  ;;  %p87_p8 = scmp.ne.s32.totalorder %s53_s0, %s86_s24  ;;  %p92_p10 = scmp.lt.s32.totalorder %s86_s24, %s86_s24 }
  0x17   :  { %v41_v10 = vsub.s32 %v38_v6, %v28_v3 }
  0x18   :  { %v30_v8 = vrot.slane %v25_v7, %v29_v4  ;;  %v34_v9 = vrot.slane %v25_v7, %v33_v5  ;;  %p93_p11 = por %p92_p10, %p91_p9 }
  0x1a   :  { %v35_v11 = vcombine.low %v30_v8, %v34_v9  ;;  %p94_p12 = pnand %p93_p11, %p87_p8 }
  0x1c   :  { %v42_v13 = vrot.slane %v35_v11, %v41_v10 }
  0x1e   :  { %v44_v14 = vadd.f32 %v42_v13, %v24_v12 }
  0x20   :  { %45 = vst [vmem:[#allocation5] sm:$0xf] %v44_v14 }
  0x21   :  { %97 = shalt.err (!%p94_p12)
}
  0x22   :  { %s98_s26 = scalar_lea.hbm %s159_s2, 64 }
  0x23   :  { %p99_p13 = scmp.ne.s32.totalorder %s159_s2, %s98_s26  ;;  %p102_p0 = scmp.lt.u32.totalorder %s98_s26, %s159_s2 }
  0x25   :  { %p104_p1 = pnand %p102_p0, %p99_p13 }
  0x27   :  { %107 = shalt.err (!%p104_p1)
}
  0x28   :  { %55 = dma.vmem_to_hbm [thread:$0]  %s53_s0, 64, %s159_s2, [#allocation4]  }
  0x29   :  { %110 = dma.done.wait [#allocation4], 64  }
  0x2a   :  { %111 = vsyncadd [#allocation4], 4294967232 }
  0x2b   :  { %59 = vsyncpa [#allocation3], 1 }
  0x2c   :  { %60 = vsyncpa [#allocation4], 1 }

</bundles_post_ra>
